<compile_context>
chip_gen: v7x
topology: tpu7x:2x2x1
jax: 0.10.0
libtpu: 0.0.40
codegen_flags: <defaults>
</compile_context>

<pallas_src>
import functools

import jax
import jax.numpy as jnp
from jax import lax
from jax.experimental import pallas as pl
from jax.experimental.pallas import tpu as pltpu

LANE = 128
SUB = 8
CHUNK_ROWS = 256                 # inner-loop chunk: 256x128 f32 = 128 KiB, ~32 vregs/temp
TARGET_BLOCK_BYTES = 1 << 20     # ~1 MiB per stream per pipeline buffer
NEG_PAD = -1e4                   # tanh(0.5 * -1e4) == -1 exactly  ->  sigmoid == 0 exactly


def _sigmoid(x):
    # 1 EUP push (tanh) + 2 VPU ops instead of exp + reciprocal (2 EUP pushes).
    return 0.5 * jnp.tanh(0.5 * x) + 0.5


def _iou_kernel(x_ref, t_ref, out_ref, acc_inter, acc_sum, *,
                block_rows, tail_rows, smooth):
    i = pl.program_id(0)
    nb = pl.num_programs(0)

    @pl.when(i == 0)
    def _init():
        acc_inter[...] = jnp.zeros_like(acc_inter)
        acc_sum[...] = jnp.zeros_like(acc_sum)

    def chunk_partials(start, nrows):
        """(SUB, LANE) partial sums over rows [start, start+nrows); nrows % SUB == 0."""
        x = x_ref[pl.ds(start, nrows), :].astype(jnp.float32)
        t = t_ref[pl.ds(start, nrows), :].astype(jnp.float32)
        p = _sigmoid(x)
        inter = p * t
        tot = p + t
        return (inter.reshape(nrows // SUB, SUB, LANE).sum(axis=0),
                tot.reshape(nrows // SUB, SUB, LANE).sum(axis=0))

    def accumulate(valid_rows):
        """Fold rows [0, valid_rows) of the current block into the accumulators.

        `valid_rows` is a trace-time constant, so the steady-state path carries
        zero masking/index arithmetic and the tail block simply reads less.
        """
        full_chunks = valid_rows // CHUNK_ROWS

        if full_chunks > 0:
            def body(k, carry):
                ai, asum = carry
                off = pl.multiple_of(k * CHUNK_ROWS, CHUNK_ROWS)
                di, dsum = chunk_partials(off, CHUNK_ROWS)
                return ai + di, asum + dsum

            zeros = jnp.zeros((SUB, LANE), jnp.float32)
            ai, asum = lax.fori_loop(0, full_chunks, body, (zeros, zeros))
            acc_inter[...] += ai
            acc_sum[...] += asum

        rem = valid_rows - full_chunks * CHUNK_ROWS
        if rem:
            base = full_chunks * CHUNK_ROWS
            r8 = (rem // SUB) * SUB
            if r8:
                di, dsum = chunk_partials(base, r8)
                acc_inter[...] += di
                acc_sum[...] += dsum
            ragged = rem - r8                       # 0..7 leftover rows (once per call)
            if ragged:
                x = x_ref[pl.ds(base + r8, ragged), :].astype(jnp.float32)
                t = t_ref[pl.ds(base + r8, ragged), :].astype(jnp.float32)
                p = _sigmoid(x)
                acc_inter[0:1, :] += (p * t).sum(axis=0, keepdims=True)
                acc_sum[0:1, :] += (p + t).sum(axis=0, keepdims=True)

    if tail_rows == block_rows:
        # Every block is full: one straight-line path, no masking of any kind.
        accumulate(block_rows)
    else:
        @pl.when(i < nb - 1)
        def _steady():
            accumulate(block_rows)

        @pl.when(i == nb - 1)
        def _tail():
            accumulate(tail_rows)

    @pl.when(i == nb - 1)
    def _finalize():
        intersection = jnp.sum(acc_inter[...])
        total = jnp.sum(acc_sum[...])
        union = total - intersection
        iou = (intersection + smooth) / (union + smooth)
        out_ref[...] = jnp.reshape(1.0 - iou, (1, 1))


def iou_loss(inputs, targets, smooth=1.0):
    """Pallas-TPU implementation of IoULoss.forward (returns a scalar)."""
    n = int(inputs.size)
    x = jnp.reshape(inputs, (-1,))
    t = jnp.reshape(targets, (-1,))
    if not jnp.issubdtype(t.dtype, jnp.floating):
        t = t.astype(jnp.float32)

    # Lane alignment.  When n % 128 == 0 (typical for NCHW feature maps) the
    # 2-D reshape below is a free bitcast and NO padding / extra HBM traffic
    # occurs.  Otherwise pad only to the next lane boundary: x with a large
    # negative constant (exact sigmoid == 0) and t with zeros, so the kernel
    # needs no element mask and no finalize correction.
    rem = n % LANE
    if rem:
        # TODO(synk): a fully copy-free unaligned path would need memory_space=pl.ANY
        # plus manual DMA of the ragged tail; jnp.pad costs one extra HBM round trip.
        pad = LANE - rem
        x = jnp.pad(x, (0, pad), constant_values=NEG_PAD)
        t = jnp.pad(t, (0, pad), constant_values=0)
    rows = (n + LANE - 1) // LANE

    x2 = x.reshape(rows, LANE)
    t2 = t.reshape(rows, LANE)

    # Dtype-aware block sizing: ~1 MiB per stream per pipeline buffer, rows a
    # multiple of CHUNK_ROWS (itself a multiple of 8/16/32 sublane packing).
    itemsize = max(x2.dtype.itemsize, t2.dtype.itemsize)
    max_rows = max(TARGET_BLOCK_BYTES // (LANE * itemsize), CHUNK_ROWS)
    max_rows = (max_rows // CHUNK_ROWS) * CHUNK_ROWS

    if rows <= max_rows:
        block_rows = rows            # full extent: exempt from the (8,128) rule
        num_blocks = 1
        tail_rows = rows
    else:
        block_rows = max_rows
        num_blocks = (rows + block_rows - 1) // block_rows
        tail_rows = rows - (num_blocks - 1) * block_rows

    kernel = functools.partial(
        _iou_kernel, block_rows=block_rows, tail_rows=tail_rows,
        smooth=float(smooth))

    bytes_in = n * (x2.dtype.itemsize + t2.dtype.itemsize)
    cost = pl.CostEstimate(flops=6 * n, transcendentals=n,
                           bytes_accessed=bytes_in + 4)

    out = pl.pallas_call(
        kernel,
        out_shape=jax.ShapeDtypeStruct((1, 1), jnp.float32),
        grid_spec=pltpu.PrefetchScalarGridSpec(
            num_scalar_prefetch=0,
            grid=(num_blocks,),
            in_specs=[
                pl.BlockSpec((block_rows, LANE), lambda i: (i, 0)),
                pl.BlockSpec((block_rows, LANE), lambda i: (i, 0)),
            ],
            out_specs=pl.BlockSpec((1, 1), lambda i: (0, 0)),
            scratch_shapes=[pltpu.VMEM((SUB, LANE), jnp.float32)] * 2,
        ),
        compiler_params=pltpu.CompilerParams(
            dimension_semantics=("arbitrary",),
            vmem_limit_bytes=32 * 1024 * 1024),
        cost_estimate=cost,
    )(x2, t2)
    return out[0, 0]


def _reference_iou_loss(inputs, targets, smooth=1.0):
    """Pure-JAX reference mirroring the PyTorch IoULoss module."""
    p = jax.nn.sigmoid(jnp.reshape(inputs, (-1,)).astype(jnp.float32))
    t = jnp.reshape(targets, (-1,)).astype(jnp.float32)
    intersection = jnp.sum(p * t)
    total = jnp.sum(p + t)
    union = total - intersection
    return 1.0 - (intersection + smooth) / (union + smooth)


if __name__ == "__main__":
    key = jax.random.PRNGKey(0)
    k_x, k_t = jax.random.split(key)
    B, C, H, W = 2, 4, 16, 16                     # NCHW, like the PyTorch conv outputs
    logits = jax.random.normal(k_x, (B, C, H, W), dtype=jnp.float32)
    targets = jax.random.bernoulli(k_t, 0.3, (B, C, H, W)).astype(jnp.float32)

    loss = iou_loss(logits, targets, smooth=1.0)
    loss = jax.block_until_ready(loss)

    ref = _reference_iou_loss(logits, targets, smooth=1.0)
    assert jnp.allclose(loss, ref, rtol=1e-5, atol=1e-5), (loss, ref)

    print("KERNEL_OK")
</pallas_src>

<mosaic_0001>
module attributes {stable_mosaic.version = 11 : i64} {
  func.func @_iou_kernel(%arg0: i32, %arg1: memref<16x128xf32, #tpu.memory_space<vmem>>, %arg2: memref<16x128xf32, #tpu.memory_space<vmem>>, %arg3: memref<1x1xf32, #tpu.memory_space<vmem>>, %arg4: memref<8x128xf32, #tpu.memory_space<vmem>>, %arg5: memref<8x128xf32, #tpu.memory_space<vmem>>) attributes {dimension_semantics = [#tpu.dimension_semantics<arbitrary>], iteration_bounds = array<i64: 1>, scalar_prefetch = 0 : i64, scratch_operands = 2 : i64, tpu.core_type = #tpu.core_type<tc>, window_params = [{transform_indices = @transform_0, window_bounds = array<i64: 16, 128>}, {transform_indices = @transform_1, window_bounds = array<i64: 16, 128>}, {pipeline_mode = #tpu.pipeline_mode<synchronous>, transform_indices = @transform_2, window_bounds = array<i64: 1, 1>}]} {
    %c0_i32 = arith.constant 0 : i32
    %0 = arith.cmpi eq, %arg0, %c0_i32 : i32
    %1 = arith.extui %0 : i1 to i32
    %c0_i32_0 = arith.constant 0 : i32
    %2 = arith.cmpi ne, %1, %c0_i32_0 : i32
    scf.if %2 {
      %cst_18 = arith.constant 0.000000e+00 : f32
      %27 = vector.broadcast %cst_18 : f32 to vector<8x128xf32>
      %c0_19 = arith.constant 0 : index
      %c0_20 = arith.constant 0 : index
      %28 = vector.load %arg4[%c0_19, %c0_20] : memref<8x128xf32, #tpu.memory_space<vmem>>, vector<8x128xf32>
      tpu.vector_store %arg4[%c0_19, %c0_20], %27 {strides = array<i32>} : memref<8x128xf32, #tpu.memory_space<vmem>>, vector<8x128xf32>,
      %cst_21 = arith.constant 0.000000e+00 : f32
      %29 = vector.broadcast %cst_21 : f32 to vector<8x128xf32>
      %c0_22 = arith.constant 0 : index
      %c0_23 = arith.constant 0 : index
      %30 = vector.load %arg5[%c0_22, %c0_23] : memref<8x128xf32, #tpu.memory_space<vmem>>, vector<8x128xf32>
      tpu.vector_store %arg5[%c0_22, %c0_23], %29 {strides = array<i32>} : memref<8x128xf32, #tpu.memory_space<vmem>>, vector<8x128xf32>,
    } else {
    }
    %c0 = arith.constant 0 : index
    %c0_1 = arith.constant 0 : index
    %3 = vector.load %arg1[%c0, %c0_1] : memref<16x128xf32, #tpu.memory_space<vmem>>, vector<16x128xf32>
    %c0_2 = arith.constant 0 : index
    %c0_3 = arith.constant 0 : index
    %4 = vector.load %arg2[%c0_2, %c0_3] : memref<16x128xf32, #tpu.memory_space<vmem>>, vector<16x128xf32>
    %cst = arith.constant 5.000000e-01 : f32
    %5 = vector.broadcast %cst : f32 to vector<16x128xf32>
    %6 = arith.mulf %5, %3 : vector<16x128xf32>
    %7 = math.tanh %6 : vector<16x128xf32>
    %cst_4 = arith.constant 5.000000e-01 : f32
    %8 = vector.broadcast %cst_4 : f32 to vector<16x128xf32>
    %9 = arith.mulf %8, %7 : vector<16x128xf32>
    %cst_5 = arith.constant 5.000000e-01 : f32
    %10 = vector.broadcast %cst_5 : f32 to vector<16x128xf32>
    %11 = arith.addf %9, %10 : vector<16x128xf32>
    %12 = arith.mulf %11, %4 : vector<16x128xf32>
    %13 = arith.addf %11, %4 : vector<16x128xf32>
    %14 = vector.shape_cast %12 : vector<16x128xf32> to vector<2x8x128xf32>
    %cst_6 = arith.constant dense<0.000000e+00> : vector<8x128xf32>
    %15 = vector.multi_reduction <add>, %14, %cst_6 [0] : vector<2x8x128xf32> to vector<8x128xf32>
    %16 = vector.shape_cast %13 : vector<16x128xf32> to vector<2x8x128xf32>
    %cst_7 = arith.constant dense<0.000000e+00> : vector<8x128xf32>
    %17 = vector.multi_reduction <add>, %16, %cst_7 [0] : vector<2x8x128xf32> to vector<8x128xf32>
    %c0_8 = arith.constant 0 : index
    %c0_9 = arith.constant 0 : index
    %18 = vector.load %arg4[%c0_8, %c0_9] : memref<8x128xf32, #tpu.memory_space<vmem>>, vector<8x128xf32>
    %19 = arith.addf %18, %15 : vector<8x128xf32>
    %c0_10 = arith.constant 0 : index
    %c0_11 = arith.constant 0 : index
    %20 = vector.load %arg4[%c0_10, %c0_11] : memref<8x128xf32, #tpu.memory_space<vmem>>, vector<8x128xf32>
    tpu.vector_store %arg4[%c0_10, %c0_11], %19 {strides = array<i32>} : memref<8x128xf32, #tpu.memory_space<vmem>>, vector<8x128xf32>,
    %c0_12 = arith.constant 0 : index
    %c0_13 = arith.constant 0 : index
    %21 = vector.load %arg5[%c0_12, %c0_13] : memref<8x128xf32, #tpu.memory_space<vmem>>, vector<8x128xf32>
    %22 = arith.addf %21, %17 : vector<8x128xf32>
    %c0_14 = arith.constant 0 : index
    %c0_15 = arith.constant 0 : index
    %23 = vector.load %arg5[%c0_14, %c0_15] : memref<8x128xf32, #tpu.memory_space<vmem>>, vector<8x128xf32>
    tpu.vector_store %arg5[%c0_14, %c0_15], %22 {strides = array<i32>} : memref<8x128xf32, #tpu.memory_space<vmem>>, vector<8x128xf32>,
    %c0_i32_16 = arith.constant 0 : i32
    %24 = arith.cmpi eq, %arg0, %c0_i32_16 : i32
    %25 = arith.extui %24 : i1 to i32
    %c0_i32_17 = arith.constant 0 : i32
    %26 = arith.cmpi ne, %25, %c0_i32_17 : i32
    scf.if %26 {
      %c0_18 = arith.constant 0 : index
      %c0_19 = arith.constant 0 : index
      %27 = vector.load %arg4[%c0_18, %c0_19] : memref<8x128xf32, #tpu.memory_space<vmem>>, vector<8x128xf32>
      %28 = vector.shape_cast %27 : vector<8x128xf32> to vector<1x8x128xf32>
      %cst_20 = arith.constant dense<0.000000e+00> : vector<1xf32>
      %29 = vector.multi_reduction <add>, %28, %cst_20 [1, 2] : vector<1x8x128xf32> to vector<1xf32>
      %30 = vector.shape_cast %29 : vector<1xf32> to vector<1x1x1xf32>
      %31 = vector.extract %30[0, 0, 0] : f32 from vector<1x1x1xf32>
      %c0_21 = arith.constant 0 : index
      %c0_22 = arith.constant 0 : index
      %32 = vector.load %arg5[%c0_21, %c0_22] : memref<8x128xf32, #tpu.memory_space<vmem>>, vector<8x128xf32>
      %33 = vector.shape_cast %32 : vector<8x128xf32> to vector<1x8x128xf32>
      %cst_23 = arith.constant dense<0.000000e+00> : vector<1xf32>
      %34 = vector.multi_reduction <add>, %33, %cst_23 [1, 2] : vector<1x8x128xf32> to vector<1xf32>
      %35 = vector.shape_cast %34 : vector<1xf32> to vector<1x1x1xf32>
      %36 = vector.extract %35[0, 0, 0] : f32 from vector<1x1x1xf32>
      %37 = arith.subf %36, %31 : f32
      %cst_24 = arith.constant 1.000000e+00 : f32
      %38 = arith.addf %31, %cst_24 : f32
      %cst_25 = arith.constant 1.000000e+00 : f32
      %39 = arith.addf %37, %cst_25 : f32
      %40 = arith.divf %38, %39 : f32
      %cst_26 = arith.constant 1.000000e+00 : f32
      %41 = arith.subf %cst_26, %40 : f32
      %42 = vector.broadcast %41 : f32 to vector<1x1xf32>
      %c0_27 = arith.constant 0 : index
      %c0_28 = arith.constant 0 : index
      %43 = vector.load %arg3[%c0_27, %c0_28] : memref<1x1xf32, #tpu.memory_space<vmem>>, vector<1x1xf32>
      tpu.vector_store %arg3[%c0_27, %c0_28], %42 {strides = array<i32>} : memref<1x1xf32, #tpu.memory_space<vmem>>, vector<1x1xf32>,
    } else {
    }
    return
  }
  func.func @transform_0(%arg0: i32) -> (i32, i32) {
    %c0_i32 = arith.constant 0 : i32
    %c0_i32_0 = arith.constant 0 : i32
    return %arg0, %c0_i32 : i32, i32
  }
  func.func @transform_1(%arg0: i32) -> (i32, i32) {
    %c0_i32 = arith.constant 0 : i32
    %c0_i32_0 = arith.constant 0 : i32
    return %arg0, %c0_i32 : i32, i32
  }
  func.func @transform_2(%arg0: i32) -> (i32, i32) {
    %c0_i32 = arith.constant 0 : i32
    %c0_i32_0 = arith.constant 0 : i32
    %c0_i32_1 = arith.constant 0 : i32
    return %c0_i32, %c0_i32_0 : i32, i32
  }
}

</mosaic_0001>

<bundles_post_ra>
// kernel: tpu_custom_call.1
= control target key start
LH: loop header
LB: loop body
LE: loop exit
PB: predicated region body
PF: predicated region fallthrough
CT: control target
= control target key end

     0   :  { %7 = vsyncpa [#allocation5], 0  ;;  %s265_s0 = inlined_call_operand.hbm [shape: f32[16,128], index: 0, kind: input, shape index: {}]   ;;  %s266_s1 = inlined_call_operand.hbm [shape: f32[16,128], index: 1, kind: input, shape index: {}]   ;;  %s267_s2 = inlined_call_operand.hbm [shape: f32[1,1], index: 2, kind: output, shape index: {}]  }
   0x1   :  { %8 = vsyncpa [#allocation8], 0 }
   0x2   :  { %9 = vsyncpa [#allocation6], 0  ;;  %s209_s9 = smov [#allocation4]   ;;  %s137_s13 = scalar_lea.hbm %s265_s0, 256 }
   0x3   :  { %s15_s10 = sshll.u32 %s209_s9, 4  ;;  %p138_p0 = scmp.ne.s32.totalorder %s265_s0, %s137_s13  ;;  %s16_s10 = int_to_ptr.vmem [resolvable:$true] %s15_s10 }
   0x4   :  { %p141_p1 = scmp.lt.u32.totalorder %s137_s13, %s265_s0 }
   0x6   :  { %p143_p2 = pnand %p141_p1, %p138_p0 }
   0x8   :  { %146 = shalt.err (!%p143_p2)
}
   0x9   :  { %s147_s18 = scalar_lea.vmem %s16_s10, 256  ;;  %p152_p4 = scmp.lt.s32.totalorder %s16_s10, %s16_s10 }
   0xa   :  { %p148_p3 = scmp.ne.s32.totalorder %s16_s10, %s147_s18  ;;  %p153_p5 = scmp.lt.s32.totalorder %s147_s18, %s147_s18 }
   0xc   :  { %p154_p6 = por %p153_p5, %p152_p4 }
   0xe   :  { %p155_p7 = pnand %p154_p6, %p148_p3 }
  0x10   :  { %158 = shalt.err (!%p155_p7)
}
  0x11   :  { %s210_s19 = smov 128   ;;  %s211_s20 = smov 8  }
  0x12   :  { %21 = dma.hbm_to_vmem [thread:$0]  %s265_s0, 256, %s16_s10, [#allocation5], %s210_s19, %s210_s19, %s211_s20  }
  0x13   :  { %s212_s23 = smov [#allocation7]   ;;  %s159_s27 = scalar_lea.hbm %s266_s1, 256 }
  0x14   :  { %s27_s24 = sshll.u32 %s212_s23, 4  ;;  %p160_p8 = scmp.ne.s32.totalorder %s266_s1, %s159_s27  ;;  %s28_s24 = int_to_ptr.vmem [resolvable:$true] %s27_s24 }
  0x15   :  { %p163_p9 = scmp.lt.u32.totalorder %s159_s27, %s266_s1 }
  0x17   :  { %p165_p10 = pnand %p163_p9, %p160_p8 }
  0x19   :  { %168 = shalt.err (!%p165_p10)
}
  0x1a   :  { %s169_s4 = scalar_lea.vmem %s28_s24, 256  ;;  %p174_p12 = scmp.lt.s32.totalorder %s28_s24, %s28_s24 }
  0x1b   :  { %p170_p11 = scmp.ne.s32.totalorder %s28_s24, %s169_s4  ;;  %p175_p13 = scmp.lt.s32.totalorder %s169_s4, %s169_s4 }
  0x1d   :  { %p176_p0 = por %p175_p13, %p174_p12 }
  0x1f   :  { %p177_p1 = pnand %p176_p0, %p170_p11 }
  0x21   :  { %180 = shalt.err (!%p177_p1)
}
  0x22   :  { %33 = dma.hbm_to_vmem [thread:$0]  %s266_s1, 256, %s28_s24, [#allocation8], %s210_s19, %s210_s19, %s211_s20  }
  0x23   :  { %203 = dma.done.wait [#allocation5], 256  }
  0x24   :  { %204 = vsyncadd [#allocation5], 4294967040 }
  0x25   :  { %205 = dma.done.wait [#allocation8], 256  }
  0x26   :  { %206 = vsyncadd [#allocation8], 4294967040  ;;  %v46_v0 = vld [vmem:[#allocation4] sm:$0xff]  ;;  %v47_v1 = vld [vmem:[#allocation4 + $0x8] sm:$0xff]  ;;  %s213_s12 = smov [#allocation9]   ;;  %vm102_vm0 = vcmask 0  }
  0x27   :  { %v50_v2 = vmul.f32 0.5, %v46_v0  ;;  %v51_v3 = vmul.f32 0.5, %v47_v1  ;;  %v48_v7 = vld [vmem:[#allocation7] sm:$0xff]  ;;  %v49_v9 = vld [vmem:[#allocation7 + $0x8] sm:$0xff]  ;;  %s110_s13 = sshll.u32 %s213_s12, 4  ;;  %s111_s13 = int_to_ptr.vmem [resolvable:$true] %s110_s13 }
  0x28   :  { %s181_s15 = scalar_lea.vmem %s111_s13, 16  ;;  %s185_s16 = scalar_lea.vmem %s111_s13, 32 }
  0x29   :  { %131 = vtanh.f32 %v50_v2  ;;  %p182_p2 = scmp.ne.s32.totalorder %s111_s13, %s181_s15  ;;  %p186_p3 = scmp.lt.s32.totalorder %s111_s13, %s111_s13 }
  0x2a   :  { %133 = vtanh.f32 %v51_v3  ;;  %p187_p4 = scmp.lt.s32.totalorder %s185_s16, %s181_s15 }
  0x2c   :  { %p188_p5 = por %p187_p4, %p186_p3 }
  0x2e   :  { %p189_p6 = pnand %p188_p5, %p182_p2 }
  0x33   :  { %v132_v4 = vpop.eup %131 }
  0x34   :  { %v134_v5 = vpop.eup %133  ;;  %v54_v6 = vmul.f32 0.5, %v132_v4 }
  0x35   :  { %v55_v8 = vmul.f32 0.5, %v134_v5 }
  0x36   :  { %v56_v10 = vadd.f32 0.5, %v54_v6 }
  0x37   :  { %v57_v11 = vadd.f32 0.5, %v55_v8 }
  0x38   :  { %v58_v12 = vmul.f32 %v56_v10, %v48_v7  ;;  %v60_v14 = vadd.f32 %v56_v10, %v48_v7 }
  0x39   :  { %v59_v13 = vmul.f32 %v57_v11, %v49_v9  ;;  %v61_v15 = vadd.f32 %v57_v11, %v49_v9 }
  0x3b   :  { %v62_v16 = vadd.f32 %v59_v13, %v58_v12  ;;  %v63_v17 = vadd.f32 %v61_v15, %v60_v14 }
  0x3d   :  { %74 = vadd.xlane.f32.xlu0 %v62_v16 }
  0x41   :  { %84 = vadd.xlane.f32.xlu0 %v63_v17 }
  0xca   :  { %v75_v18 = vpop.xlane.xlu0 %74 }
  0xcb   :  { %v76_v19 = vrot.slane %v75_v18, 4 }
  0xcd   :  { %v77_v20 = vadd.f32 %v76_v19, %v75_v18 }
  0xce   :  { %v85_v21 = vpop.xlane.xlu0 %84 }
  0xcf   :  { %v78_v22 = vrot.slane %v77_v20, 2  ;;  %v86_v23 = vrot.slane %v85_v21, 4 }
  0xd1   :  { %v87_v24 = vadd.f32 %v86_v23, %v85_v21  ;;  %v79_v25 = vadd.f32 %v78_v22, %v77_v20 }
  0xd3   :  { %v88_v26 = vrot.slane %v87_v24, 2  ;;  %v80_v27 = vrot.slane %v79_v25, 1 }
  0xd5   :  { %v89_v28 = vadd.f32 %v88_v26, %v87_v24  ;;  %v81_v29 = vadd.f32 %v80_v27, %v79_v25 }
  0xd7   :  { %120 = vpush %v81_v29  ;;  %v90_v30 = vrot.slane %v89_v28, 1 }
  0xd9   :  { %v91_v31 = vadd.f32 %v90_v30, %v89_v28 }
  0xdb   :  { %122 = vpush %v91_v31 }
 0x108   :  { %s121_s1 = spop %120 }
 0x109   :  { %s94_s9 = sadd.f32 1.0, %s121_s1 }
 0x10c   :  { %s123_s6 = spop %122 }
 0x10d   :  { %s93_s7 = ssub.f32 %s123_s6, %s121_s1 }
 0x10f   :  { %s95_s8 = sadd.f32 1.0, %s93_s7 }
 0x111   :  { %v96_v32 = vstv %s95_s8 }
 0x112   :  { %135 = vrcp.f32 %v96_v32 }
 0x11c   :  { %v136_v33 = vpop.eup %135 }
 0x11d   :  { %124 = vpush %v136_v33 }
 0x14e   :  { %s125_s10 = spop %124 }
 0x14f   :  { %s99_s11 = smul.f32 %s125_s10, %s94_s9 }
 0x151   :  { %s100_s14 = ssub.f32 1.0, %s99_s11 }
 0x153   :  { %v101_v34 = vstv %s100_s14 }
 0x154   :  { %103 = vst.msk [vmem:[#allocation9] sm:$0x1] %vm102_vm0, %v101_v34 }
 0x155   :  { %192 = shalt.err (!%p189_p6)
}
 0x156   :  { %s193_s19 = scalar_lea.hbm %s267_s2, 16 }
 0x157   :  { %p194_p7 = scmp.ne.s32.totalorder %s267_s2, %s193_s19  ;;  %p197_p8 = scmp.lt.u32.totalorder %s193_s19, %s267_s2 }
 0x159   :  { %p199_p9 = pnand %p197_p8, %p194_p7 }
 0x15b   :  { %202 = shalt.err (!%p199_p9)
}
 0x15c   :  { %113 = dma.vmem_to_hbm [thread:$0]  %s111_s13, 16, %s267_s2, [#allocation6]  }
 0x15d   :  { %207 = dma.done.wait [#allocation6], 16  }
 0x15e   :  { %208 = vsyncadd [#allocation6], 4294967280 }
 0x15f   :  { %117 = vsyncpa [#allocation5], 1 }
 0x160   :  { %118 = vsyncpa [#allocation8], 1 }
 0x161   :  { %119 = vsyncpa [#allocation6], 1 }

</bundles_post_ra>
